<compile_context>
chip_gen: v7x
topology: tpu7x:2x2x1
jax: 0.10.0
libtpu: 0.0.40
codegen_flags: <defaults>
</compile_context>

<pallas_src>
from functools import partial

import jax
import jax.numpy as jnp
from jax.experimental import pallas as pl
from jax.experimental.pallas import tpu as pltpu


# --------------------------------------------------------------------------- #
# Kernel
# --------------------------------------------------------------------------- #
def _mixing_kernel(bias_ref, head_bias_ref, x_ref, out_ref, attn_ref, *,
                   softmax: bool, bias_resident: bool, row_tile: int):
    # bias_ref:      (N, N)  if bias_resident else (TN, N)
    # head_bias_ref: (1, TN, N)   current head, current row tile
    # x_ref:         (1, N, BDhP) current head's inputs, batch folded into lanes
    # out_ref:       (1, TN, BDhP)
    # attn_ref:      (1, TN, N)
    if bias_resident:
        r = pl.program_id(1)
        start = pl.multiple_of(r * row_tile, row_tile)
        b = bias_ref[pl.ds(start, row_tile), :]
    else:
        b = bias_ref[...]

    logits = b.astype(jnp.float32) + head_bias_ref[0].astype(jnp.float32)
    if softmax:
        m = jnp.max(logits, axis=-1, keepdims=True)
        e = jnp.exp(logits - m)
        # Exact reciprocal on the (TN, 1) denominator: rows of the *returned*
        # attn sum to 1 (the approx EUP reciprocal was only ~1e-3 accurate and
        # the divide is over a single narrow column, so it is essentially free).
        attn = e * (1.0 / jnp.sum(e, axis=-1, keepdims=True))
    else:
        attn = logits

    # TODO(synk): attn_drop (nn.Dropout) omitted — identity for p=0.0 / eval.
    attn_ref[0] = attn.astype(attn_ref.dtype)

    # Cast attn to x's dtype so bf16 inputs run the MXU at bf16 rate; keep f32
    # accumulation.  (For softmax=False with bf16 x the matmul therefore uses
    # bf16-rounded logits even though attn is returned at attn_dtype.)
    out_ref[0] = jnp.dot(
        attn.astype(x_ref.dtype), x_ref[0], preferred_element_type=jnp.float32
    ).astype(out_ref.dtype)


# --------------------------------------------------------------------------- #
# VMEM budgeting / tiling
# --------------------------------------------------------------------------- #
def _tpu_vmem_capacity_bytes() -> int:
    """Physical VMEM of the current TPU generation (conservative fallback)."""
    try:
        info = pltpu.get_tpu_info()
        cap = int(getattr(info, "vmem_capacity_bytes", 0) or 0)
        if cap > 0:
            return cap
    except Exception:
        pass
    return 64 * 1024 * 1024  # v7x per-core VMEM; safe lower bound everywhere


def _vmem_estimate(tn: int, n: int, bdh: int, x_bytes: int, attn_bytes: int,
                   bias_rows: int, param_bytes: int) -> int:
    """Resident-set estimate for one grid step (double-buffered pipeline)."""
    tile_f32 = tn * n * 4
    return (
        2 * bias_rows * n * param_bytes      # bias block (resident or tiled)
        + 2 * tn * n * param_bytes           # head_bias tile
        + 2 * tn * n * attn_bytes            # attn output tile
        + 2 * n * bdh * x_bytes              # x per-head input block
        + 2 * tn * bdh * x_bytes             # y output tile
        + 3 * tile_f32 + tn * n * x_bytes    # in-kernel softmax temporaries
    )


def _choose_tiling(n: int, bdh: int, x_bytes: int, attn_bytes: int,
                   param_bytes: int, num_heads: int, budget: int,
                   row_tile=None):
    """Pick (row_tile TN, bias_resident) under the VMEM budget."""
    def fits(tn, bias_rows):
        return _vmem_estimate(tn, n, bdh, x_bytes, attn_bytes,
                              bias_rows, param_bytes) <= budget

    if row_tile is not None:
        assert n % row_tile == 0 and (row_tile % 8 == 0 or row_tile == n), (
            "row_tile must divide N and be a multiple of 8 (or equal N)")
        return row_tile, (num_heads > 1 and fits(row_tile, n))

    # Candidates: N itself plus every divisor of N that is a multiple of 8
    # (second-to-last block dim must be 8-aligned or equal the full dim).
    cands = sorted({n} | {d for d in range(8, n, 8) if n % d == 0}, reverse=True)

    tn_tiled = next((t for t in cands if fits(t, t)), None)
    if tn_tiled is None:
        # TODO(synk): add a K-tiled (online-softmax over the contraction axis)
        # variant for very large N * B * Dh instead of failing.
        raise ValueError(
            f"Mixing kernel: no row tile of N={n} fits the VMEM budget "
            f"({budget} bytes) with B*Dh={bdh}; reduce batch/head_dim/seq_len.")

    tn_res = next((t for t in cands if fits(t, n)), None)
    # A resident bias removes ~(H-1)*N^2*param_bytes of HBM reads; accept it as
    # long as it does not push the row tile below ~512 (pipelining knee).
    use_resident = (num_heads > 1 and tn_res is not None
                    and tn_res >= min(tn_tiled, 512))
    return (tn_res, True) if use_resident else (tn_tiled, False)


# --------------------------------------------------------------------------- #
# Wrapper
# --------------------------------------------------------------------------- #
def mixing_forward(x, bias, head_bias, *, num_heads: int, softmax: bool = True,
                   attn_dtype=None, compute_dtype=None, row_tile=None):
    """x: (B, N, C) -> (x_out (B, N, C), attn (1, H, N, N)).

    attn_dtype:    dtype of the returned attn (default f32 = PyTorch semantics;
                   bf16 halves the largest HBM write stream).
    compute_dtype: dtype x/attn are cast to for the matmul (default None keeps
                   x.dtype; bf16 gives full MXU rate for f32 inputs — accuracy
                   decision left to the caller).
    """
    B, N, C = x.shape
    H = num_heads
    assert C % H == 0, "dim should be divisible by num_heads"
    Dh = C // H
    BDh = B * Dh
    attn_dt = jnp.dtype(attn_dtype) if attn_dtype is not None else jnp.dtype(jnp.float32)

    # Layout glue: (B, N, C) -> (H, N, B*Dh), batch folded into the lane dim so
    # each head runs one wide, lane-dense MXU matmul.
    xw = x.reshape(B, N, H, Dh).transpose(2, 1, 0, 3).reshape(H, N, BDh)
    if compute_dtype is not None:
        xw = xw.astype(compute_dtype)
    x_bytes = jnp.dtype(xw.dtype).itemsize

    # Lane padding: pad B*Dh to a multiple of 128 -> unmasked stores, full MXU
    # columns.  The (8,128)-tiled HBM layout pads the minor dim anyway, so this
    # costs no extra HBM bytes. (256 would fill the v6e/v7x MXU width but the
    # kernel is HBM-bound, so we keep the minimal 128 alignment.)
    LANE = 128
    BDhP = ((BDh + LANE - 1) // LANE) * LANE
    if BDhP != BDh:
        xw = jnp.pad(xw, ((0, 0), (0, 0), (0, BDhP - BDh)))

    cap = _tpu_vmem_capacity_bytes()
    budget = int(0.72 * cap)  # ~46 MiB on v7x, ~92 MiB on v5e/v6e
    param_bytes = jnp.dtype(bias.dtype).itemsize

    TN, bias_resident = _choose_tiling(
        N, BDhP, x_bytes, attn_dt.itemsize, param_bytes, H, budget, row_tile)
    R = N // TN

    est = _vmem_estimate(TN, N, BDhP, x_bytes, attn_dt.itemsize,
                         N if bias_resident else TN, param_bytes)
    vmem_limit = min(int(0.98 * cap), max(32 * 1024 * 1024, est + (8 << 20)))

    kernel = partial(_mixing_kernel, softmax=softmax,
                     bias_resident=bias_resident, row_tile=TN)

    if bias_resident:
        # Constant block index -> bias is DMA'd from HBM exactly once.
        bias_spec = pl.BlockSpec((N, N), lambda h, r: (0, 0))
    else:
        bias_spec = pl.BlockSpec((TN, N), lambda h, r: (r, 0))

    y, attn = pl.pallas_call(
        kernel,
        out_shape=(
            jax.ShapeDtypeStruct((H, N, BDhP), x.dtype),
            jax.ShapeDtypeStruct((H, N, N), attn_dt),
        ),
        grid_spec=pltpu.PrefetchScalarGridSpec(
            num_scalar_prefetch=0,
            grid=(H, R),  # H leading: megacore shards by head, x stays resident
            in_specs=[
                bias_spec,                                          # bias
                pl.BlockSpec((1, TN, N), lambda h, r: (h, r, 0)),   # head_bias
                pl.BlockSpec((1, N, BDhP), lambda h, r: (h, 0, 0)), # x per head
            ],
            out_specs=[
                pl.BlockSpec((1, TN, BDhP), lambda h, r: (h, r, 0)),  # y
                pl.BlockSpec((1, TN, N), lambda h, r: (h, r, 0)),     # attn
            ],
        ),
        compiler_params=pltpu.CompilerParams(
            dimension_semantics=("parallel", "parallel"),
            vmem_limit_bytes=vmem_limit,
        ),
    )(bias, head_bias, xw)

    if BDhP != BDh:
        y = y[:, :, :BDh]
    x_out = y.reshape(H, N, B, Dh).transpose(2, 1, 0, 3).reshape(B, N, C)
    return x_out, attn[None]  # unsqueeze(0) -> (1, H, N, N)


def init_params(key, seq_len: int, num_heads: int):
    # trunc_normal_(bias, std=0.02): truncated normal in [-2std, 2std]
    bias = 0.02 * jax.random.truncated_normal(
        key, -2.0, 2.0, (seq_len, seq_len), dtype=jnp.float32)
    head_bias = jnp.zeros((num_heads, seq_len, seq_len), dtype=jnp.float32)
    return bias, head_bias


# --------------------------------------------------------------------------- #
# Self-test
# --------------------------------------------------------------------------- #
def _reference(x, bias, head_bias, num_heads, softmax):
    B, N, C = x.shape
    xh = x.reshape(B, N, num_heads, C // num_heads).transpose(0, 2, 1, 3)
    logits = bias[None] + head_bias
    attn = jax.nn.softmax(logits, axis=-1) if softmax else logits
    out = jnp.einsum("hnk,bhkd->bhnd", attn, xh)
    return out.transpose(0, 2, 1, 3).reshape(B, N, C), attn


if __name__ == "__main__":
    key = jax.random.PRNGKey(0)
    kx, kb, kh = jax.random.split(key, 3)

    # ---- Test 1: small shapes, softmax=True and softmax=False -------------
    B, N, C, H = 2, 8, 32, 4  # head_dim = 8, B*Dh = 16 -> padded to 128 lanes
    x = jax.random.normal(kx, (B, N, C), dtype=jnp.float32)
    bias, head_bias = init_params(kb, N, H)
    head_bias = head_bias + 0.01 * jax.random.normal(kh, head_bias.shape, jnp.float32)

    x_out, attn = mixing_forward(x, bias, head_bias, num_heads=H, softmax=True)
    jax.block_until_ready((x_out, attn))
    ref_out, ref_attn = _reference(x, bias, head_bias, H, True)
    assert jnp.allclose(attn[0], ref_attn, atol=1e-5, rtol=1e-5), "attn mismatch"
    assert jnp.allclose(x_out, ref_out, atol=2e-3, rtol=1e-3), "x mismatch"

    x_out2, attn2 = mixing_forward(x, bias, head_bias, num_heads=H, softmax=False)
    jax.block_until_ready((x_out2, attn2))
    ref_out2, ref_attn2 = _reference(x, bias, head_bias, H, False)
    assert jnp.allclose(attn2[0], ref_attn2, atol=1e-5), "attn (no softmax) mismatch"
    assert jnp.allclose(x_out2, ref_out2, atol=2e-3, rtol=1e-3), "x (no softmax) mismatch"

    # ---- Test 2: exercises row tiling (R>1) + resident bias path ----------
    B2, N2, C2, H2 = 2, 256, 64, 4
    kx2, kb2, kh2 = jax.random.split(jax.random.PRNGKey(0), 3)
    x2 = jax.random.normal(kx2, (B2, N2, C2), dtype=jnp.float32)
    bias2, head_bias2 = init_params(kb2, N2, H2)
    head_bias2 = head_bias2 + 0.01 * jax.random.normal(kh2, head_bias2.shape, jnp.float32)

    x_out3, attn3 = mixing_forward(x2, bias2, head_bias2, num_heads=H2,
                                   softmax=True, row_tile=128)
    jax.block_until_ready((x_out3, attn3))
    ref_out3, ref_attn3 = _reference(x2, bias2, head_bias2, H2, True)
    assert jnp.allclose(attn3[0], ref_attn3, atol=1e-5, rtol=1e-5), "attn (tiled) mismatch"
    assert jnp.allclose(x_out3, ref_out3, atol=3e-3, rtol=1e-2), "x (tiled) mismatch"

    # ---- Test 3: bf16 compute + bf16 attn output (opt-in fast path) -------
    x_out4, attn4 = mixing_forward(x, bias, head_bias, num_heads=H, softmax=True,
                                   compute_dtype=jnp.bfloat16,
                                   attn_dtype=jnp.bfloat16)
    jax.block_until_ready((x_out4, attn4))
    assert jnp.allclose(attn4[0].astype(jnp.float32), ref_attn, atol=5e-3), \
        "attn (bf16) mismatch"
    assert jnp.allclose(x_out4, ref_out, atol=0.05, rtol=0.05), "x (bf16) mismatch"

    print("KERNEL_OK")
</pallas_src>

<mosaic_0001>
module attributes {stable_mosaic.version = 11 : i64} {
  func.func @_mixing_kernel(%arg0: i32, %arg1: i32, %arg2: memref<8x8xf32, #tpu.memory_space<vmem>>, %arg3: memref<1x8x8xf32, #tpu.memory_space<vmem>>, %arg4: memref<1x8x128xf32, #tpu.memory_space<vmem>>, %arg5: memref<1x8x128xf32, #tpu.memory_space<vmem>>, %arg6: memref<1x8x8xf32, #tpu.memory_space<vmem>>) attributes {dimension_semantics = [#tpu.dimension_semantics<parallel>, #tpu.dimension_semantics<parallel>], iteration_bounds = array<i64: 4, 1>, scalar_prefetch = 0 : i64, scratch_operands = 0 : i64, tpu.core_type = #tpu.core_type<tc>, window_params = [{pipeline_mode = #tpu.pipeline_mode<synchronous>, transform_indices = @transform_0, window_bounds = array<i64: 8, 8>}, {transform_indices = @transform_1, window_bounds = array<i64: 1, 8, 8>}, {transform_indices = @transform_2, window_bounds = array<i64: 1, 8, 128>}, {transform_indices = @transform_3, window_bounds = array<i64: 1, 8, 128>}, {transform_indices = @transform_4, window_bounds = array<i64: 1, 8, 8>}]} {
    %c8_i32 = arith.constant 8 : i32
    %0 = arith.muli %arg1, %c8_i32 : i32
    %1 = tpu.assume_multiple %0, 8 : i32
    %2 = arith.index_cast %1 : i32 to index
    %c0 = arith.constant 0 : index
    %3 = vector.load %arg2[%2, %c0] : memref<8x8xf32, #tpu.memory_space<vmem>>, vector<8x8xf32>
    %c0_0 = arith.constant 0 : index
    %c0_1 = arith.constant 0 : index
    %c0_2 = arith.constant 0 : index
    %4 = vector.load %arg3[%c0_0, %c0_1, %c0_2] : memref<1x8x8xf32, #tpu.memory_space<vmem>>, vector<1x8x8xf32>
    %5 = vector.shape_cast %4 : vector<1x8x8xf32> to vector<8x8xf32>
    %6 = arith.addf %3, %5 : vector<8x8xf32>
    %cst = arith.constant dense<0xFF800000> : vector<8xf32>
    %7 = vector.multi_reduction <maximumf>, %6, %cst [1] : vector<8x8xf32> to vector<8xf32>
    %8 = vector.shape_cast %7 : vector<8xf32> to vector<8x1xf32>
    %9 = vector.broadcast %8 : vector<8x1xf32> to vector<8x8xf32>
    %10 = arith.subf %6, %9 : vector<8x8xf32>
    %11 = math.exp %10 : vector<8x8xf32>
    %cst_3 = arith.constant dense<0.000000e+00> : vector<8xf32>
    %12 = vector.multi_reduction <add>, %11, %cst_3 [1] : vector<8x8xf32> to vector<8xf32>
    %13 = vector.shape_cast %12 : vector<8xf32> to vector<8x1xf32>
    %cst_4 = arith.constant 1.000000e+00 : f32
    %14 = vector.broadcast %cst_4 : f32 to vector<8x1xf32>
    %15 = arith.divf %14, %13 : vector<8x1xf32>
    %16 = vector.broadcast %15 : vector<8x1xf32> to vector<8x8xf32>
    %17 = arith.mulf %11, %16 : vector<8x8xf32>
    %c0_5 = arith.constant 0 : index
    %c0_6 = arith.constant 0 : index
    %c0_7 = arith.constant 0 : index
    %18 = vector.load %arg6[%c0_5, %c0_6, %c0_7] : memref<1x8x8xf32, #tpu.memory_space<vmem>>, vector<1x8x8xf32>
    %19 = vector.shape_cast %18 : vector<1x8x8xf32> to vector<8x8xf32>
    %20 = vector.shape_cast %17 : vector<8x8xf32> to vector<1x8x8xf32>
    tpu.vector_store %arg6[%c0_5, %c0_6, %c0_7], %20 {strides = array<i32>} : memref<1x8x8xf32, #tpu.memory_space<vmem>>, vector<1x8x8xf32>,
    %c0_8 = arith.constant 0 : index
    %c0_9 = arith.constant 0 : index
    %c0_10 = arith.constant 0 : index
    %21 = vector.load %arg4[%c0_8, %c0_9, %c0_10] : memref<1x8x128xf32, #tpu.memory_space<vmem>>, vector<1x8x128xf32>
    %22 = vector.shape_cast %21 : vector<1x8x128xf32> to vector<8x128xf32>
    %cst_11 = arith.constant dense<0.000000e+00> : vector<8x128xf32>
    %23 = tpu.matmul %17, %22, %cst_11 {dimension_numbers = #tpu.dot_dimension_numbers<[1], [0], [0], [1], [0, 0, 1, 1], [], []>} : vector<8x8xf32>, vector<8x128xf32>, vector<8x128xf32> -> vector<8x128xf32>
    %c0_12 = arith.constant 0 : index
    %c0_13 = arith.constant 0 : index
    %c0_14 = arith.constant 0 : index
    %24 = vector.load %arg5[%c0_12, %c0_13, %c0_14] : memref<1x8x128xf32, #tpu.memory_space<vmem>>, vector<1x8x128xf32>
    %25 = vector.shape_cast %24 : vector<1x8x128xf32> to vector<8x128xf32>
    %26 = vector.shape_cast %23 : vector<8x128xf32> to vector<1x8x128xf32>
    tpu.vector_store %arg5[%c0_12, %c0_13, %c0_14], %26 {strides = array<i32>} : memref<1x8x128xf32, #tpu.memory_space<vmem>>, vector<1x8x128xf32>,
    return
  }
  func.func @transform_0(%arg0: i32, %arg1: i32) -> (i32, i32) {
    %c0_i32 = arith.constant 0 : i32
    %c0_i32_0 = arith.constant 0 : i32
    %c0_i32_1 = arith.constant 0 : i32
    return %c0_i32, %c0_i32_0 : i32, i32
  }
  func.func @transform_1(%arg0: i32, %arg1: i32) -> (i32, i32, i32) {
    %c0_i32 = arith.constant 0 : i32
    %c0_i32_0 = arith.constant 0 : i32
    return %arg0, %arg1, %c0_i32 : i32, i32, i32
  }
  func.func @transform_2(%arg0: i32, %arg1: i32) -> (i32, i32, i32) {
    %c0_i32 = arith.constant 0 : i32
    %c0_i32_0 = arith.constant 0 : i32
    %c0_i32_1 = arith.constant 0 : i32
    return %arg0, %c0_i32, %c0_i32_0 : i32, i32, i32
  }
  func.func @transform_3(%arg0: i32, %arg1: i32) -> (i32, i32, i32) {
    %c0_i32 = arith.constant 0 : i32
    %c0_i32_0 = arith.constant 0 : i32
    return %arg0, %arg1, %c0_i32 : i32, i32, i32
  }
  func.func @transform_4(%arg0: i32, %arg1: i32) -> (i32, i32, i32) {
    %c0_i32 = arith.constant 0 : i32
    %c0_i32_0 = arith.constant 0 : i32
    return %arg0, %arg1, %c0_i32 : i32, i32, i32
  }
}

</mosaic_0001>

<bundles_post_ra>
// kernel: tpu_custom_call.1
= control target key start
LH: loop header
LB: loop body
LE: loop exit
PB: predicated region body
PF: predicated region fallthrough
CT: control target
= control target key end

     0   :  { %s1209_s0 = inlined_call_operand.hbm [shape: f32[8,8], index: 0, kind: input, shape index: {}]   ;;  %s1210_s1 = inlined_call_operand.hbm [shape: f32[4,8,8], index: 1, kind: input, shape index: {}]   ;;  %s1211_s2 = inlined_call_operand.hbm [shape: f32[4,8,128], index: 2, kind: input, shape index: {}]   ;;  %s1212_s3 = inlined_call_operand.hbm [shape: f32[4,8,128], index: 3, kind: output, shape index: {0}]   ;;  %s1213_s4 = inlined_call_operand.hbm [shape: f32[4,8,8], index: 4, kind: output, shape index: {1}]  }
   0x1   :  { %1219 = sst [smem:[#allocation15_spill]] %s1210_s1 }
   0x2   :  { %10 = vsyncpa [#allocation3], 0 }
   0x3   :  { %11 = vsyncpa [#allocation6], 0 }
   0x4   :  { %13 = vsyncpa [#allocation6 + $0x1], 0 }
   0x5   :  { %14 = vsyncpa [#allocation4], 0 }
   0x6   :  { %16 = vsyncpa [#allocation4 + $0x1], 0 }
   0x7   :  { %17 = vsyncpa [#allocation10], 0 }
   0x8   :  { %19 = vsyncpa [#allocation10 + $0x1], 0  ;;  %s923_s15 = smov 0   ;;  %s925_s16 = smov 0  }
   0x9   :  { %s927_s17 = smov 0   ;;  %s929_s18 = smov 0  }
   0xa   :  { %s931_s19 = smov 0   ;;  %s933_s20 = smov 0  }
   0xb LB: > { %s37_s21 = sadd.s32 1, %s885_s19  ;;  %s67_s22 = sadd.s32 1, %s877_s17  ;;  %s889_s20 = sphi %s933_s20, %s25_s20   ;;  %s885_s19 = sphi %s931_s19, %s1240_s19   ;;  %s881_s18 = sphi %s929_s18, %s1239_s18   ;;  %s877_s17 = sphi %s927_s17, %s1238_s17   ;;  %s873_s16 = sphi %s925_s16, %s1237_s16   ;;  %s869_s15 = sphi %s923_s15, %s1236_s15  }
   0xc   : > { %p39_p0 = scmp.ge.s32.totalorder %s37_s21, 4  ;;  %p74_p1 = scmp.ne.s32.totalorder %s877_s17, %s873_s16 }
   0xd   : > { %p75_p2 = scmp.eq.s32.totalorder %s889_s20, 0  ;;  %p625_p4 = scmp.lt.s32.totalorder %s889_s20, 4 }
   0xe   : > { %s1242_s21 = smov (%p39_p0, %s37_s21), 0  ;;  %s197_s24 = sand.u32 1, %s889_s20  }
   0xf   : > { %p76_p3 = por %p75_p2, %p74_p1  ;;  %s62_s23 = ssub.s32 %s885_s19, %s1242_s21 }
  0x10   : > { %p65_p5 = scmp.eq.s32.totalorder %s62_s23, 0  ;;  %s199_s25 = sand.u32 1, %s877_s17  }
  0x11   : > { %s571_s26 = sshll.u32 %s885_s19, 7  ;;  %s972_s28 = sshll.u32 %s199_s25, 3 }
  0x12   : > { %s970_s27 = scalar_select %p65_p5, %s877_s17, %s67_s22  }
  0x13   : > { %s1220_s1 = sld [smem:[#allocation15_spill]]  ;;  %p981_p6 = pnand %p625_p4, %p76_p3 }
  0x14   : > { %s201_s7 = scalar_lea.vmem [#allocation5], %s972_s28  ;;  %s988_s9 = scalar_lea.sflag [#allocation6], %s197_s24 }
  0x15   : > { %s209_s8 = sshll.u32 %s201_s7, 4  ;;  %p685_p8 = pneg %p981_p6  ;;  %s986_s8 = int_to_ptr.vmem [resolvable:$true] %s209_s8 }
  0x19   : > { %s979_s5 = scalar_lea.hbm %s1220_s1, %s571_s26  ;;  %s688_s13 = scalar_lea.hbm %s1220_s1, 512 }
  0x1a   : > { %s683_s10 = scalar_lea.hbm %s979_s5, 128  ;;  %p689_p11 = scmp.lt.u32.totalorder %s979_s5, %s1220_s1 }
  0x1b   : > { %p684_p7 = scmp.ne.s32.totalorder %s979_s5, %s683_s10  ;;  %p690_p12 = scmp.lt.u32.totalorder %s688_s13, %s683_s10 }
  0x1c   : > { %p692_p0 = scmp.lt.u32.totalorder %s683_s10, %s979_s5 }
  0x1d   : > { %p686_p9 = pnand %p685_p8, %p684_p7  ;;  %p691_p13 = por %p690_p12, %p689_p11 }
  0x1f   : > { %p687_p10 = pneg %p686_p9  ;;  %p693_p2 = por %p692_p0, %p691_p13 }
  0x21   : > { %p694_p3 = pnand %p693_p2, %p687_p10 }
  0x23   : > { %697 = shalt.err (!%p694_p3)
}
  0x24   : > { %s698_s23 = scalar_lea.vmem %s986_s8, 128  ;;  %s891_s24 = smov [#allocation5]  }
  0x25   : > { %p699_p4 = scmp.ne.s32.totalorder %s986_s8, %s698_s23  ;;  %s703_s25 = sshll.u32 %s891_s24, 4  ;;  %s704_s25 = int_to_ptr.vmem [resolvable:$false] %s703_s25 }
  0x26   : > { %s705_s29 = scalar_lea.vmem %s704_s25, 256  ;;  %p706_p9 = scmp.lt.s32.totalorder %s986_s8, %s704_s25 }
  0x27   : > { %p701_p5 = pnand %p699_p4, %p685_p8  ;;  %p707_p11 = scmp.lt.s32.totalorder %s705_s29, %s698_s23 }
  0x29   : > { %p702_p7 = pneg %p701_p5  ;;  %p708_p12 = por %p707_p11, %p706_p9 }
  0x2b   : > { %p709_p13 = pnand %p708_p12, %p702_p7 }
  0x2d   : > { %712 = shalt.err (!%p709_p13)
}
  0x2e   : > { %613 = dma.hbm_to_vmem [thread:$0]  (!%p981_p6), %s979_s5, 128, %s986_s8, %s988_s9  }
  0x2f   : > { %s1017_s30 = sadd.s32 4294967295, %s889_s20   ;;  %s566_s7 = sadd.s32 4294967294, %s889_s20  }
  0x30   : > { %p80_p10 = scmp.ne.s32.totalorder %s873_s16, %s869_s15  ;;  %p1214_p0 = scmp.eq.s32.totalorder %s1017_s30, 0 }
  0x31   : > { %p132_p2 = scmp.eq.s32.totalorder %s1017_s30, 3  ;;  %p138_p3 = scmp.eq.s32.totalorder %s566_s7, 3 }
  0x32   : > { %p567_p4 = scmp.ge.s32.totalorder %s889_s20, 1  ;;  %p1027_p5 = por %p1214_p0, %p80_p10 }
  0x33   : > { %p1034_p7 = por %p132_p2, %p74_p1  ;;  %p1038_p9 = por %p138_p3, %p80_p10 }
  0x34   : > { %s1222_s10 = scalar_select %p1027_p5, 1, 0 }
  0x35   : > { %s1223_s5 = scalar_select %p1034_p7, 1, 0 }
  0x36   : > { %s1224_s8 = scalar_select %p1038_p9, 1, 0 }
  0x37   : > { %p173_p11 = scmp.lt.s32.totalorder %s889_s20, 5  ;;  %s1048_s13 = scalar_lea.hbm %s1211_s2, %s571_s26 }
  0x38   : > { %s892_s22 = smov [#allocation2]   ;;  %s220_s24 = scalar_lea.vmem [#allocation7], %s972_s28 }
  0x39   : > { %p1050_p12 = pnand %p567_p4, %p173_p11  ;;  %s1054_s23 = sshll.u32 %s892_s22, 4  ;;  %s187_s23 = int_to_ptr.vmem [resolvable:$true] %s1054_s23 }
  0x3a   : > { %s227_s25 = sshll.u32 %s220_s24, 4  ;;  %s713_s29 = scalar_lea.hbm %s1048_s13, 128  ;;  %s228_s25 = int_to_ptr.vmem [resolvable:$true] %s227_s25 }
  0x3b   : > { %s1225_s14 = scalar_select %p1050_p12, 1, 0 }
  0x3c   : > { %p714_p13 = scmp.ne.s32.totalorder %s1048_s13, %s713_s29  ;;  %s718_s11 = scalar_lea.hbm %s1211_s2, 512 }
  0x3d   : > { %p719_p3 = scmp.lt.u32.totalorder %s1048_s13, %s1211_s2  ;;  %p720_p4 = scmp.lt.u32.totalorder %s718_s11, %s713_s29 }
  0x3e   : > { %p716_p10 = pnand %p714_p13, %p685_p8  ;;  %p722_p0 = scmp.lt.u32.totalorder %s713_s29, %s1048_s13 }
  0x3f   : > { %p721_p11 = por %p720_p4, %p719_p3 }
  0x40   : > { %p717_p2 = pneg %p716_p10 }
  0x41   : > { %p723_p9 = por %p722_p0, %p721_p11 }
  0x43   : > { %p724_p1 = pnand %p723_p9, %p717_p2 }
  0x45   : > { %727 = shalt.err (!%p724_p1)
}
  0x46   : > { %s728_s28 = scalar_lea.vmem %s228_s25, 128  ;;  %s893_s22 = smov [#allocation7]  }
  0x47   : > { %p729_p7 = scmp.ne.s32.totalorder %s228_s25, %s728_s28  ;;  %s733_s24 = sshll.u32 %s893_s22, 4  ;;  %s734_s24 = int_to_ptr.vmem [resolvable:$false] %s733_s24 }
  0x48   : > { %s735_s26 = scalar_lea.vmem %s734_s24, 256  ;;  %p736_p5 = scmp.lt.s32.totalorder %s228_s25, %s734_s24 }
  0x49   : > { %p731_p13 = pnand %p729_p7, %p685_p8  ;;  %p737_p12 = scmp.lt.s32.totalorder %s735_s26, %s728_s28 }
  0x4b   : > { %p732_p10 = pneg %p731_p13  ;;  %p738_p3 = por %p737_p12, %p736_p5 }
  0x4d   : > { %p739_p4 = pnand %p738_p3, %p732_p10 }
  0x4f   : > { %742 = shalt.err (!%p739_p4)
}
  0x50   : > { %616 = dma.hbm_to_vmem [thread:$0]  (!%p981_p6), %s1048_s13, 128, %s228_s25, %s988_s9  }
  0x51   : > { %p1226_p8 = scmp.eq.s32.totalorder %s1017_s30, 0  ;;  %p1227_p0 = scmp.ne.s32.totalorder %s1225_s14, 0 }
  0x52   : > { %s743_s11 = scalar_lea.hbm %s1209_s0, 128 }
  0x53   : > { %p1228_p7 = pneg %p1227_p0  ;;  %p744_p5 = scmp.ne.s32.totalorder %s1209_s0, %s743_s11 }
  0x54   : > { %p750_p2 = scmp.lt.u32.totalorder %s743_s11, %s1209_s0 }
  0x55   : > { %p1085_p9 = pnand %p1228_p7, %p1226_p8 }
  0x57   : > { %p745_p12 = pneg %p1085_p9 }
  0x59   : > { %p746_p6 = pnand %p745_p12, %p744_p5 }
  0x5b   : > { %p747_p1 = pneg %p746_p6 }
  0x5d   : > { %p752_p11 = pnand %p750_p2, %p747_p1 }
  0x5f   : > { %755 = shalt.err (!%p752_p11)
}
  0x60   : > { %s756_s25 = scalar_lea.vmem %s187_s23, 128  ;;  %p764_p4 = scmp.lt.s32.totalorder %s187_s23, %s187_s23 }
  0x61   : > { %p757_p13 = scmp.ne.s32.totalorder %s187_s23, %s756_s25  ;;  %p765_p8 = scmp.lt.s32.totalorder %s756_s25, %s756_s25 }
  0x63   : > { %p759_p10 = pnand %p757_p13, %p745_p12  ;;  %p766_p7 = por %p765_p8, %p764_p4 }
  0x65   : > { %p760_p3 = pneg %p759_p10 }
  0x67   : > { %p767_p0 = pnand %p766_p7, %p760_p3 }
  0x69   : > { %770 = shalt.err (!%p767_p0)
}
  0x6a   : > { %609 = dma.hbm_to_vmem [thread:$0]  (!%p1085_p9), %s1209_s0, 128, %s187_s23, [#allocation3]  }
  0x6b   : > { %p1230_p5 = scmp.ne.s32.totalorder %s1225_s14, 0 }
  0x6c   : > { %p1231_p6 = scmp.eq.s32.totalorder (!%p1230_p5), %s1017_s30, 0 }
  0x6d   : > { %236 = sbr.rel (%p1230_p5) target bundleno = 665 (0x299), region = 32 }
  0x74   : > { %852 = dma.done.wait (%p1231_p6), [#allocation3], 128   ;;  %p1232_p12 = pmov %p1231_p6 }
  0x75   : > { %s242_s24 = sand.u32 1, %s1017_s30   ;;  %s1113_s26 = sand.u32 1, %s873_s16  }
  0x76   : > { %854 = vsyncadd (%p1232_p12), [#allocation3], 4294967168  ;;  %s1116_s1 = sshll.u32 %s1113_s26, 3  ;;  %s243_s23 = scalar_lea.sflag [#allocation6], %s242_s24 }
  0x77   : > { %s246_s29 = scalar_lea.vmem [#allocation5], %s1116_s1  ;;  %p1233_p0 = scmp.ne.s32.totalorder %s1222_s10, 0 }
  0x79   : > { %856 = dma.done.wait (%p1233_p0), %s243_s23, 256  }
  0x7a   : > { %858 = vsyncadd (%p1233_p0), %s243_s23, 4294967040  ;;  %v292_v0 = vld [vmem:[#allocation2] sm:$0xff]  ;;  %v293_v1 = vld [vmem:[%s246_s29] sm:$0xff]  ;;  %vm295_vm0 = vcmask 64512   ;;  %v894_v9 = vmov 0.0   ;;  %s255_s30 = scalar_lea.vmem [#allocation7], %s1116_s1 }
  0x7b   : > { %v294_v2 = vadd.f32 %v293_v1, %v292_v0  ;;  %589 = vmatprep.subr.mxu0 %v894_v9  ;;  %v309_v10 = vld [vmem:[%s255_s30] sm:$0xff]  ;;  %vm895_vm1 = vmmov 0   ;;  %s289_s10 = scalar_lea.vmem [#allocation9], %s1116_s1  ;;  %s583_s14 = sshll.u32 %s881_s18, 7 }
  0x7c   : > { %591 = vmatprep.mubr.msk.f32.mxu0 %vm895_vm1, %v894_v9  ;;  %590 = vmatpush3.msra.mxu0 %v309_v10  ;;  %s1135_s6 = scalar_lea.hbm %s1213_s4, %s583_s14  ;;  %s418_s12 = sshll.u32 %s289_s10, 4  ;;  %s419_s12 = int_to_ptr.vmem [resolvable:$true] %s418_s12 }
  0x7d   : > { %v296_v3 = vsel %vm295_vm0, %v294_v2, -inf  ;;  %s390_s9 = scalar_lea.sflag [#allocation10], %s1113_s26  ;;  %s771_s13 = scalar_lea.vmem %s419_s12, 128 }
  0x7e   : > { %297 = vmax.xlane.f32.xlu0 %v296_v3  ;;  %p772_p9 = scmp.ne.s32.totalorder %s419_s12, %s771_s13  ;;  %p1234_p1 = scmp.ne.s32.totalorder %s1223_s5, 0 }
  0x7f   : > { %s896_s25 = smov [#allocation9]  }
  0x80   : > { %p773_p2 = pnand %p772_p9, %p1234_p1  ;;  %s775_s28 = sshll.u32 %s896_s25, 4  ;;  %s776_s28 = int_to_ptr.vmem [resolvable:$false] %s775_s28 }
  0x81   : > { %s777_s22 = scalar_lea.vmem %s776_s28, 256  ;;  %p778_p13 = scmp.lt.s32.totalorder %s419_s12, %s776_s28 }
  0x82   : > { %p774_p11 = pneg %p773_p2  ;;  %p779_p10 = scmp.lt.s32.totalorder %s777_s22, %s771_s13 }
  0x84   : > { %p780_p3 = por %p779_p10, %p778_p13 }
  0x86   : > { %p781_p4 = pnand %p780_p3, %p774_p11 }
 0x10b   : > { %v298_v4 = vpop.xlane.xlu0 %297 }
 0x10c   : > { %v299_v5 = vsub.f32 %v294_v2, %v298_v4 }
 0x10e   : > { %v300_v6 = vmul.f32 1.442695, %v299_v5 }
 0x110   : > { %679 = vpow2.f32 %v300_v6 }
 0x11a   : > { %v680_v7 = vpop.eup %679 }
 0x11b   : > { %v302_v8 = vsel %vm295_vm0, %v680_v7, 0.0 }
 0x11c   : > { %303 = vadd.xlane.f32.xlu0 %v302_v8 }
 0x1a9   : > { %v304_v11 = vpop.xlane.xlu0 %303 }
 0x1aa   : > { %681 = vrcp.f32 %v304_v11 }
 0x1b4   : > { %v682_v12 = vpop.eup %681 }
 0x1b5   : > { %v307_v13 = vmul.f32 %v682_v12, %v680_v7 }
 0x1b7   : > { %592 = vmatmul.mubr.msk.f32.vlgmr.msra.gmra.mrb[0].mxu0 %vm295_vm0, %v307_v13  ;;  %308 = vst.msk [vmem:[%s289_s10] sm:$0xff] %vm295_vm0, %v307_v13 }
 0x1b8   : > { %784 = shalt.err (!%p781_p4)
}
 0x1b9   : > { %s785_s24 = scalar_lea.hbm %s1135_s6, 128  ;;  %s789_s30 = scalar_lea.hbm %s1213_s4, 512 }
 0x1ba   : > { %p786_p8 = scmp.ne.s32.totalorder %s1135_s6, %s785_s24  ;;  %p790_p6 = scmp.lt.u32.totalorder %s1135_s6, %s1213_s4 }
 0x1bb   : > { %p791_p12 = scmp.lt.u32.totalorder %s789_s30, %s785_s24  ;;  %p793_p9 = scmp.lt.u32.totalorder %s785_s24, %s1135_s6 }
 0x1bc   : > { %p787_p7 = pnand %p786_p8, %p1234_p1 }
 0x1bd   : > { %p792_p0 = por %p791_p12, %p790_p6 }
 0x1be   : > { %p788_p5 = pneg %p787_p7 }
 0x1bf   : > { %p794_p2 = por %p793_p9, %p792_p0 }
 0x1c1   : > { %p795_p11 = pnand %p794_p2, %p788_p5 }
 0x1c3   : > { %798 = shalt.err (!%p795_p11)
}
 0x1c4   : > { %603 = dma.vmem_to_hbm [thread:$0]  (%p1234_p1), %s419_s12, 128, %s1135_s6, %s390_s9  }
 0x1c5   : > { %s282_s11 = scalar_lea.vmem [#allocation8], %s1116_s1  ;;  %s1163_s22 = scalar_lea.hbm %s1212_s3, %s583_s14 }
 0x1c6   : > { %s404_s13 = sshll.u32 %s282_s11, 4  ;;  %s385_s24 = scalar_lea.sflag [#allocation4], %s1113_s26  ;;  %s1156_s13 = int_to_ptr.vmem [resolvable:$true] %s404_s13 }
 0x1c7   : > { %s799_s23 = scalar_lea.vmem %s1156_s13, 128  ;;  %s897_s1 = smov [#allocation8]  }
 0x1c8   : > { %p800_p13 = scmp.ne.s32.totalorder %s1156_s13, %s799_s23  ;;  %s803_s6 = sshll.u32 %s897_s1, 4  ;;  %s804_s6 = int_to_ptr.vmem [resolvable:$false] %s803_s6 }
 0x1c9   : > { %s805_s18 = scalar_lea.vmem %s804_s6, 256  ;;  %p806_p4 = scmp.lt.s32.totalorder %s1156_s13, %s804_s6 }
 0x1ca   : > { %p801_p10 = pnand %p800_p13, %p1234_p1  ;;  %p807_p8 = scmp.lt.s32.totalorder %s805_s18, %s799_s23 }
 0x1cc   : > { %p802_p3 = pneg %p801_p10  ;;  %p808_p7 = por %p807_p8, %p806_p4 }
 0x1ce   : > { %p809_p5 = pnand %p808_p7, %p802_p3 }
 0x28a   : > { %v379_v14 = vpop.f32.mrb[0].mxu0 }
 0x28b   : > { %383 = vst [vmem:[%s282_s11] sm:$0xff] %v379_v14  ;;  %v593_v15 = vpop.f32.mrb[1].mxu0 }
 0x28c   : > { %812 = shalt.err (!%p809_p5)
}
 0x28d   : > { %s813_s26 = scalar_lea.hbm %s1163_s22, 128  ;;  %s817_s9 = scalar_lea.hbm %s1212_s3, 512 }
 0x28e   : > { %p814_p6 = scmp.ne.s32.totalorder %s1163_s22, %s813_s26  ;;  %p818_p9 = scmp.lt.u32.totalorder %s1163_s22, %s1212_s3 }
 0x28f   : > { %p819_p2 = scmp.lt.u32.totalorder %s817_s9, %s813_s26  ;;  %p821_p13 = scmp.lt.u32.totalorder %s813_s26, %s1163_s22 }
 0x290   : > { %p815_p12 = pnand %p814_p6, %p1234_p1 }
 0x291   : > { %p820_p11 = por %p819_p2, %p818_p9 }
 0x292   : > { %p816_p0 = pneg %p815_p12 }
 0x293   : > { %p822_p10 = por %p821_p13, %p820_p11 }
 0x295   : > { %p823_p3 = pnand %p822_p10, %p816_p0 }
 0x297   : > { %826 = shalt.err (!%p823_p3)
}
 0x298   : > { %602 = dma.vmem_to_hbm [thread:$0]  (%p1234_p1), %s1156_s13, 128, %s1163_s22, %s385_s24  }
 0x299 PF: > { %p627_p4 = scmp.ge.s32.totalorder %s889_s20, 2  ;;  %s430_s10 = sand.u32 1, %s869_s15  }
 0x29a   : > { %p1235_p8 = scmp.ne.s32.totalorder %s1224_s8, 0  ;;  %s431_s7 = scalar_lea.sflag [#allocation4], %s430_s10 }
 0x29c   : > { %p618_p7 = pnand %p627_p4, %p1235_p8 }
 0x29e   : > { %860 = dma.done.wait (!%p618_p7), %s431_s7, 128  }
 0x29f   : > { %862 = vsyncadd (!%p618_p7), %s431_s7, 4294967168  ;;  %s440_s11 = scalar_lea.sflag [#allocation10], %s430_s10 }
 0x2a0   : > { %864 = dma.done.wait (!%p618_p7), %s440_s11, 128  }
 0x2a1   : > { %866 = vsyncadd (!%p618_p7), %s440_s11, 4294967168  ;;  %s25_s20 = sadd.s32 1, %s889_s20   ;;  %s1236_s15 = smov %s873_s16 }
 0x2a2   : > { %p22_p5 = scmp.ge.s32.totalorder %s25_s20, 6   ;;  %s1237_s16 = smov %s877_s17 }
 0x2a3   : > { %s1238_s17 = smov %s970_s27  ;;  %s1239_s18 = smov %s885_s19 }
 0x2a4   : > { %s1240_s19 = smov %s1242_s21  ;;  %24 = sbr.rel (!%p22_p5) target bundleno = 11 (0xb), region = 111 }
 0x2ab   :  { %445 = vsyncpa [#allocation3], 1 }
 0x2ac   :  { %447 = vsyncpa [#allocation3 + $0x1], 1 }
 0x2ad   :  { %448 = vsyncpa [#allocation6], 1 }
 0x2ae   :  { %450 = vsyncpa [#allocation6 + $0x1], 1 }
 0x2af   :  { %451 = vsyncpa [#allocation4], 1 }
 0x2b0   :  { %453 = vsyncpa [#allocation4 + $0x1], 1 }
 0x2b1   :  { %454 = vsyncpa [#allocation10], 1 }
 0x2b2   :  { %456 = vsyncpa [#allocation10 + $0x1], 1 }

</bundles_post_ra>
